<compile_context>
chip_gen: v7x
topology: tpu7x:2x2x1
jax: 0.10.0
libtpu: 0.0.40
codegen_flags: <defaults>
</compile_context>

<pallas_src>
import jax
import jax.numpy as jnp
from jax.experimental import pallas as pl
from jax.experimental.pallas import tpu as pltpu

# (dh, dw) shifts applied to channel groups 0..7 along dims (H, W)
SHIFTS_LIST = [(1, 0), (-1, 0), (0, 1), (0, -1),
               (1, 1), (1, -1), (-1, 1), (-1, -1)]

_TARGET_BLOCK_BYTES = 4 << 20   # ~1-4 MiB blocks; 4x (double-buffered in+out) <= 16 MiB
_SMALL_BLOCK_BYTES = 512 << 10  # below this (and with enough steps), deepen pipelining


def _shift8_kernel(x_ref, o_ref):
    """x_ref / o_ref: (Nb, C, H, W) -- Nb batch elements, all channels."""
    nb, c, h, w = x_ref.shape
    groups = c // 8
    for i, (dh, dw) in enumerate(SHIFTS_LIST):
        lo = i * groups
        # Static channel-slab slice of the ref (tile-aligned: last two dims intact).
        blk = x_ref[:, lo:lo + groups, :, :]
        # Merge leading dims (layout-free reshape, last two dims untouched) so the
        # rolls act on a 3-D (Nb*g, H, W) value -- same form as validated before.
        blk = blk.reshape(nb * groups, h, w)
        sh = dh % h                    # static, non-negative (jnp.roll semantics)
        if sh:
            blk = pltpu.roll(blk, shift=sh, axis=1)   # H roll: sublane rotate (XLU)
        sw = dw % w
        if sw:
            blk = pltpu.roll(blk, shift=sw, axis=2)   # W roll: lane rotate (XLU)
        o_ref[:, lo:lo + groups, :, :] = blk.reshape(nb, groups, h, w)


def _pick_batch_block(n, per_image_bytes):
    """Largest divisor of n with block <= target bytes, keeping >= 2 grid steps
    (when n >= 2) so v7x can shard the DMA stream across both TensorCores."""
    if n <= 1:
        return 1
    best = 1
    for d in range(1, n // 2 + 1):
        if n % d == 0 and d * per_image_bytes <= _TARGET_BLOCK_BYTES:
            best = d
    return best


def _make_spec(block_shape, index_map, deep_buffer):
    if deep_buffer:
        try:
            return pl.BlockSpec(block_shape, index_map, pipeline_mode=pl.Buffered(3))
        except TypeError:
            pass
    return pl.BlockSpec(block_shape, index_map)


def shift8(x, groups: int = 4):
    """Pallas implementation of Shift8.forward."""
    n, c, h, w = x.shape
    assert c == groups * 8, f"expected C == 8*groups, got C={c}, groups={groups}"

    itemsize = jnp.dtype(x.dtype).itemsize
    per_image_bytes = c * h * w * itemsize
    nb = _pick_batch_block(n, per_image_bytes)
    block_bytes = nb * per_image_bytes
    num_steps = n // nb

    # 2 input + 2 output buffers (double buffering) + headroom; explicit limit so
    # large blocks still double-buffer on v5e (16 MiB scoped default) and v7x.
    vmem_limit = int(min(56 << 20, max(32 << 20, 4 * block_bytes + (4 << 20))))

    deep = (block_bytes < _SMALL_BLOCK_BYTES) and (num_steps >= 3)
    index_map = lambda b: (b, 0, 0, 0)
    in_spec = _make_spec((nb, c, h, w), index_map, deep)
    out_spec = _make_spec((nb, c, h, w), index_map, deep)

    nbytes = x.size * itemsize
    return pl.pallas_call(
        _shift8_kernel,
        out_shape=jax.ShapeDtypeStruct((n, c, h, w), x.dtype),
        grid_spec=pltpu.PrefetchScalarGridSpec(
            num_scalar_prefetch=0,
            grid=(num_steps,),
            in_specs=[in_spec],
            out_specs=out_spec,
        ),
        input_output_aliases={0: 0},   # mirrors PyTorch in-place semantics
        compiler_params=pltpu.CompilerParams(
            dimension_semantics=("parallel",),
            vmem_limit_bytes=vmem_limit),
        cost_estimate=pl.CostEstimate(
            flops=0, transcendentals=0, bytes_accessed=2 * nbytes),
    )(x)


def shift8_ref(x, groups: int = 4):
    """Pure-JAX reference mirroring the PyTorch forward."""
    parts = []
    for k, (dh, dw) in enumerate(SHIFTS_LIST):
        blk = x[:, k * groups:(k + 1) * groups, :, :]
        parts.append(jnp.roll(blk, shift=(dh, dw), axis=(2, 3)))
    return jnp.concatenate(parts, axis=1)


if __name__ == "__main__":
    groups = 4
    # C must equal 8 * groups; W kept a multiple of 128 for lane-dense stores.
    N, C, H, W = 2, groups * 8, 16, 128
    key = jax.random.PRNGKey(0)
    x = jax.random.normal(key, (N, C, H, W), dtype=jnp.float32)

    # Reference first (kernel aliases its input/output buffers).
    ref = jax.block_until_ready(shift8_ref(x, groups=groups))
    out = jax.block_until_ready(shift8(x, groups=groups))

    assert out.shape == x.shape and out.dtype == x.dtype
    assert jnp.array_equal(out, ref), "Pallas Shift8 mismatch vs reference"
    print("KERNEL_OK")
</pallas_src>

<mosaic_0001>
module attributes {stable_mosaic.version = 11 : i64} {
  func.func @_shift8_kernel(%arg0: i32, %arg1: memref<1x32x16x128xf32, #tpu.memory_space<vmem>>, %arg2: memref<1x32x16x128xf32, #tpu.memory_space<vmem>>) attributes {dimension_semantics = [#tpu.dimension_semantics<parallel>], iteration_bounds = array<i64: 2>, scalar_prefetch = 0 : i64, scratch_operands = 0 : i64, tpu.core_type = #tpu.core_type<tc>, window_params = [{transform_indices = @transform_0, window_bounds = array<i64: 1, 32, 16, 128>}, {transform_indices = @transform_1, window_bounds = array<i64: 1, 32, 16, 128>}]} {
    %c0 = arith.constant 0 : index
    %c0_0 = arith.constant 0 : index
    %c0_1 = arith.constant 0 : index
    %c0_2 = arith.constant 0 : index
    %0 = vector.load %arg1[%c0, %c0_0, %c0_1, %c0_2] : memref<1x32x16x128xf32, #tpu.memory_space<vmem>>, vector<1x4x16x128xf32>
    %1 = vector.shape_cast %0 : vector<1x4x16x128xf32> to vector<4x16x128xf32>
    %c1_i32 = arith.constant 1 : i32
    %2 = tpu.dynamic_rotate %1 by %c1_i32 dim 1 : vector<4x16x128xf32>, i32 -> vector<4x16x128xf32>
    %3 = vector.shape_cast %2 : vector<4x16x128xf32> to vector<1x4x16x128xf32>
    %c0_3 = arith.constant 0 : index
    %c0_4 = arith.constant 0 : index
    %c0_5 = arith.constant 0 : index
    %c0_6 = arith.constant 0 : index
    %4 = vector.load %arg2[%c0_3, %c0_4, %c0_5, %c0_6] : memref<1x32x16x128xf32, #tpu.memory_space<vmem>>, vector<1x4x16x128xf32>
    tpu.vector_store %arg2[%c0_3, %c0_4, %c0_5, %c0_6], %3 {strides = array<i32>} : memref<1x32x16x128xf32, #tpu.memory_space<vmem>>, vector<1x4x16x128xf32>,
    %c0_7 = arith.constant 0 : index
    %c4 = arith.constant 4 : index
    %c0_8 = arith.constant 0 : index
    %c0_9 = arith.constant 0 : index
    %5 = vector.load %arg1[%c0_7, %c4, %c0_8, %c0_9] : memref<1x32x16x128xf32, #tpu.memory_space<vmem>>, vector<1x4x16x128xf32>
    %6 = vector.shape_cast %5 : vector<1x4x16x128xf32> to vector<4x16x128xf32>
    %c15_i32 = arith.constant 15 : i32
    %7 = tpu.dynamic_rotate %6 by %c15_i32 dim 1 : vector<4x16x128xf32>, i32 -> vector<4x16x128xf32>
    %8 = vector.shape_cast %7 : vector<4x16x128xf32> to vector<1x4x16x128xf32>
    %c0_10 = arith.constant 0 : index
    %c4_11 = arith.constant 4 : index
    %c0_12 = arith.constant 0 : index
    %c0_13 = arith.constant 0 : index
    %9 = vector.load %arg2[%c0_10, %c4_11, %c0_12, %c0_13] : memref<1x32x16x128xf32, #tpu.memory_space<vmem>>, vector<1x4x16x128xf32>
    tpu.vector_store %arg2[%c0_10, %c4_11, %c0_12, %c0_13], %8 {strides = array<i32>} : memref<1x32x16x128xf32, #tpu.memory_space<vmem>>, vector<1x4x16x128xf32>,
    %c0_14 = arith.constant 0 : index
    %c8 = arith.constant 8 : index
    %c0_15 = arith.constant 0 : index
    %c0_16 = arith.constant 0 : index
    %10 = vector.load %arg1[%c0_14, %c8, %c0_15, %c0_16] : memref<1x32x16x128xf32, #tpu.memory_space<vmem>>, vector<1x4x16x128xf32>
    %11 = vector.shape_cast %10 : vector<1x4x16x128xf32> to vector<4x16x128xf32>
    %c1_i32_17 = arith.constant 1 : i32
    %12 = tpu.dynamic_rotate %11 by %c1_i32_17 dim 2 : vector<4x16x128xf32>, i32 -> vector<4x16x128xf32>
    %13 = vector.shape_cast %12 : vector<4x16x128xf32> to vector<1x4x16x128xf32>
    %c0_18 = arith.constant 0 : index
    %c8_19 = arith.constant 8 : index
    %c0_20 = arith.constant 0 : index
    %c0_21 = arith.constant 0 : index
    %14 = vector.load %arg2[%c0_18, %c8_19, %c0_20, %c0_21] : memref<1x32x16x128xf32, #tpu.memory_space<vmem>>, vector<1x4x16x128xf32>
    tpu.vector_store %arg2[%c0_18, %c8_19, %c0_20, %c0_21], %13 {strides = array<i32>} : memref<1x32x16x128xf32, #tpu.memory_space<vmem>>, vector<1x4x16x128xf32>,
    %c0_22 = arith.constant 0 : index
    %c12 = arith.constant 12 : index
    %c0_23 = arith.constant 0 : index
    %c0_24 = arith.constant 0 : index
    %15 = vector.load %arg1[%c0_22, %c12, %c0_23, %c0_24] : memref<1x32x16x128xf32, #tpu.memory_space<vmem>>, vector<1x4x16x128xf32>
    %16 = vector.shape_cast %15 : vector<1x4x16x128xf32> to vector<4x16x128xf32>
    %c127_i32 = arith.constant 127 : i32
    %17 = tpu.dynamic_rotate %16 by %c127_i32 dim 2 : vector<4x16x128xf32>, i32 -> vector<4x16x128xf32>
    %18 = vector.shape_cast %17 : vector<4x16x128xf32> to vector<1x4x16x128xf32>
    %c0_25 = arith.constant 0 : index
    %c12_26 = arith.constant 12 : index
    %c0_27 = arith.constant 0 : index
    %c0_28 = arith.constant 0 : index
    %19 = vector.load %arg2[%c0_25, %c12_26, %c0_27, %c0_28] : memref<1x32x16x128xf32, #tpu.memory_space<vmem>>, vector<1x4x16x128xf32>
    tpu.vector_store %arg2[%c0_25, %c12_26, %c0_27, %c0_28], %18 {strides = array<i32>} : memref<1x32x16x128xf32, #tpu.memory_space<vmem>>, vector<1x4x16x128xf32>,
    %c0_29 = arith.constant 0 : index
    %c16 = arith.constant 16 : index
    %c0_30 = arith.constant 0 : index
    %c0_31 = arith.constant 0 : index
    %20 = vector.load %arg1[%c0_29, %c16, %c0_30, %c0_31] : memref<1x32x16x128xf32, #tpu.memory_space<vmem>>, vector<1x4x16x128xf32>
    %21 = vector.shape_cast %20 : vector<1x4x16x128xf32> to vector<4x16x128xf32>
    %c1_i32_32 = arith.constant 1 : i32
    %22 = tpu.dynamic_rotate %21 by %c1_i32_32 dim 1 : vector<4x16x128xf32>, i32 -> vector<4x16x128xf32>
    %c1_i32_33 = arith.constant 1 : i32
    %23 = tpu.dynamic_rotate %22 by %c1_i32_33 dim 2 : vector<4x16x128xf32>, i32 -> vector<4x16x128xf32>
    %24 = vector.shape_cast %23 : vector<4x16x128xf32> to vector<1x4x16x128xf32>
    %c0_34 = arith.constant 0 : index
    %c16_35 = arith.constant 16 : index
    %c0_36 = arith.constant 0 : index
    %c0_37 = arith.constant 0 : index
    %25 = vector.load %arg2[%c0_34, %c16_35, %c0_36, %c0_37] : memref<1x32x16x128xf32, #tpu.memory_space<vmem>>, vector<1x4x16x128xf32>
    tpu.vector_store %arg2[%c0_34, %c16_35, %c0_36, %c0_37], %24 {strides = array<i32>} : memref<1x32x16x128xf32, #tpu.memory_space<vmem>>, vector<1x4x16x128xf32>,
    %c0_38 = arith.constant 0 : index
    %c20 = arith.constant 20 : index
    %c0_39 = arith.constant 0 : index
    %c0_40 = arith.constant 0 : index
    %26 = vector.load %arg1[%c0_38, %c20, %c0_39, %c0_40] : memref<1x32x16x128xf32, #tpu.memory_space<vmem>>, vector<1x4x16x128xf32>
    %27 = vector.shape_cast %26 : vector<1x4x16x128xf32> to vector<4x16x128xf32>
    %c1_i32_41 = arith.constant 1 : i32
    %28 = tpu.dynamic_rotate %27 by %c1_i32_41 dim 1 : vector<4x16x128xf32>, i32 -> vector<4x16x128xf32>
    %c127_i32_42 = arith.constant 127 : i32
    %29 = tpu.dynamic_rotate %28 by %c127_i32_42 dim 2 : vector<4x16x128xf32>, i32 -> vector<4x16x128xf32>
    %30 = vector.shape_cast %29 : vector<4x16x128xf32> to vector<1x4x16x128xf32>
    %c0_43 = arith.constant 0 : index
    %c20_44 = arith.constant 20 : index
    %c0_45 = arith.constant 0 : index
    %c0_46 = arith.constant 0 : index
    %31 = vector.load %arg2[%c0_43, %c20_44, %c0_45, %c0_46] : memref<1x32x16x128xf32, #tpu.memory_space<vmem>>, vector<1x4x16x128xf32>
    tpu.vector_store %arg2[%c0_43, %c20_44, %c0_45, %c0_46], %30 {strides = array<i32>} : memref<1x32x16x128xf32, #tpu.memory_space<vmem>>, vector<1x4x16x128xf32>,
    %c0_47 = arith.constant 0 : index
    %c24 = arith.constant 24 : index
    %c0_48 = arith.constant 0 : index
    %c0_49 = arith.constant 0 : index
    %32 = vector.load %arg1[%c0_47, %c24, %c0_48, %c0_49] : memref<1x32x16x128xf32, #tpu.memory_space<vmem>>, vector<1x4x16x128xf32>
    %33 = vector.shape_cast %32 : vector<1x4x16x128xf32> to vector<4x16x128xf32>
    %c15_i32_50 = arith.constant 15 : i32
    %34 = tpu.dynamic_rotate %33 by %c15_i32_50 dim 1 : vector<4x16x128xf32>, i32 -> vector<4x16x128xf32>
    %c1_i32_51 = arith.constant 1 : i32
    %35 = tpu.dynamic_rotate %34 by %c1_i32_51 dim 2 : vector<4x16x128xf32>, i32 -> vector<4x16x128xf32>
    %36 = vector.shape_cast %35 : vector<4x16x128xf32> to vector<1x4x16x128xf32>
    %c0_52 = arith.constant 0 : index
    %c24_53 = arith.constant 24 : index
    %c0_54 = arith.constant 0 : index
    %c0_55 = arith.constant 0 : index
    %37 = vector.load %arg2[%c0_52, %c24_53, %c0_54, %c0_55] : memref<1x32x16x128xf32, #tpu.memory_space<vmem>>, vector<1x4x16x128xf32>
    tpu.vector_store %arg2[%c0_52, %c24_53, %c0_54, %c0_55], %36 {strides = array<i32>} : memref<1x32x16x128xf32, #tpu.memory_space<vmem>>, vector<1x4x16x128xf32>,
    %c0_56 = arith.constant 0 : index
    %c28 = arith.constant 28 : index
    %c0_57 = arith.constant 0 : index
    %c0_58 = arith.constant 0 : index
    %38 = vector.load %arg1[%c0_56, %c28, %c0_57, %c0_58] : memref<1x32x16x128xf32, #tpu.memory_space<vmem>>, vector<1x4x16x128xf32>
    %39 = vector.shape_cast %38 : vector<1x4x16x128xf32> to vector<4x16x128xf32>
    %c15_i32_59 = arith.constant 15 : i32
    %40 = tpu.dynamic_rotate %39 by %c15_i32_59 dim 1 : vector<4x16x128xf32>, i32 -> vector<4x16x128xf32>
    %c127_i32_60 = arith.constant 127 : i32
    %41 = tpu.dynamic_rotate %40 by %c127_i32_60 dim 2 : vector<4x16x128xf32>, i32 -> vector<4x16x128xf32>
    %42 = vector.shape_cast %41 : vector<4x16x128xf32> to vector<1x4x16x128xf32>
    %c0_61 = arith.constant 0 : index
    %c28_62 = arith.constant 28 : index
    %c0_63 = arith.constant 0 : index
    %c0_64 = arith.constant 0 : index
    %43 = vector.load %arg2[%c0_61, %c28_62, %c0_63, %c0_64] : memref<1x32x16x128xf32, #tpu.memory_space<vmem>>, vector<1x4x16x128xf32>
    tpu.vector_store %arg2[%c0_61, %c28_62, %c0_63, %c0_64], %42 {strides = array<i32>} : memref<1x32x16x128xf32, #tpu.memory_space<vmem>>, vector<1x4x16x128xf32>,
    return
  }
  func.func @transform_0(%arg0: i32) -> (i32, i32, i32, i32) {
    %c0_i32 = arith.constant 0 : i32
    %c0_i32_0 = arith.constant 0 : i32
    %c0_i32_1 = arith.constant 0 : i32
    %c0_i32_2 = arith.constant 0 : i32
    return %arg0, %c0_i32, %c0_i32_0, %c0_i32_1 : i32, i32, i32, i32
  }
  func.func @transform_1(%arg0: i32) -> (i32, i32, i32, i32) {
    %c0_i32 = arith.constant 0 : i32
    %c0_i32_0 = arith.constant 0 : i32
    %c0_i32_1 = arith.constant 0 : i32
    %c0_i32_2 = arith.constant 0 : i32
    return %arg0, %c0_i32, %c0_i32_0, %c0_i32_1 : i32, i32, i32, i32
  }
}

</mosaic_0001>

<bundles_post_ra>
// kernel: tpu_custom_call.1
= control target key start
LH: loop header
LB: loop body
LE: loop exit
PB: predicated region body
PF: predicated region fallthrough
CT: control target
= control target key end

     0   :  { %6 = vsyncpa [#allocation3], 0  ;;  %s1303_s0 = inlined_call_operand.hbm [shape: f32[2,32,16,128], index: 0, kind: input, shape index: {}, may-alias: {0,1}]   ;;  %s1304_s1 = inlined_call_operand.hbm [shape: f32[2,32,16,128], index: 1, kind: output, shape index: {}, may-alias: {0,1}]  }
   0x1   :  { %8 = vsyncpa [#allocation3 + $0x1], 0 }
   0x2   :  { %9 = vsyncpa [#allocation4], 0 }
   0x3   :  { %11 = vsyncpa [#allocation4 + $0x1], 0  ;;  %s856_s6 = smov 0   ;;  %s858_s7 = smov 0  }
   0x4   :  { %s860_s8 = smov 0   ;;  %s862_s9 = smov 0  }
   0x5 LB: > { %s877_s10 = sadd.s32 4294967295, %s836_s9   ;;  %s560_s11 = sadd.s32 4294967294, %s836_s9   ;;  %s836_s9 = sphi %s862_s9, %s1317_s9   ;;  %s832_s8 = sphi %s860_s8, %s1316_s8   ;;  %s828_s7 = sphi %s858_s7, %s1315_s7   ;;  %s824_s6 = sphi %s856_s6, %s1314_s6  }
   0x6   : > { %s881_s12 = sadd.s32 1, %s836_s9   ;;  %s24_s13 = sadd.s32 1, %s832_s8 }
   0x7   : > { %s21_s14 = ssub.s32 %s836_s9, %s881_s12  ;;  %p31_p0 = scmp.ne.s32.totalorder %s832_s8, %s828_s7 }
   0x8   : > { %p22_p1 = scmp.eq.s32.totalorder %s21_s14, 0  ;;  %p32_p2 = scmp.eq.s32.totalorder %s836_s9, 0 }
   0x9   : > { %p37_p3 = scmp.ne.s32.totalorder %s828_s7, %s824_s6  ;;  %p38_p4 = scmp.eq.s32.totalorder %s877_s10, 0 }
   0xa   : > { %s893_s15 = scalar_select %p22_p1, %s832_s8, %s24_s13  }
   0xb   : > { %p895_p5 = por %p32_p2, %p31_p0  ;;  %p899_p6 = por %p38_p4, %p37_p3 }
   0xc   : > { %p61_p7 = scmp.eq.s32.totalorder %s877_s10, 1  ;;  %p67_p8 = scmp.eq.s32.totalorder %s560_s11, 1 }
   0xd   : > { %p700_p10 = scmp.lt.s32.totalorder %s836_s9, 2  ;;  %s87_s20 = sand.u32 1, %s832_s8  }
   0xe   : > { %p906_p11 = por %p61_p7, %p31_p0  ;;  %p910_p12 = por %p67_p8, %p37_p3 }
   0xf   : > { %s686_s21 = sshll.u32 %s836_s9, 13  ;;  %s563_s22 = sshll.u32 %s87_s20, 9 }
  0x10   : > { %s1308_s18 = scalar_select %p906_p11, 1, 0 }
  0x11   : > { %s1309_s19 = scalar_select %p910_p12, 1, 0 }
  0x12   : > { %s919_s25 = scalar_lea.hbm %s1303_s0, %s686_s21  ;;  %s91_s26 = scalar_lea.vmem [#allocation2], %s563_s22 }
  0x13   : > { %s98_s27 = sshll.u32 %s91_s26, 4  ;;  %p923_p13 = pnand %p700_p10, %p895_p5  ;;  %s927_s27 = int_to_ptr.vmem [resolvable:$true] %s98_s27 }
  0x14   : > { %s929_s29 = scalar_lea.sflag [#allocation3], %s87_s20  ;;  %s740_s30 = scalar_lea.hbm %s919_s25, 8192 }
  0x15   : > { %p741_p0 = scmp.ne.s32.totalorder %s919_s25, %s740_s30  ;;  %p742_p1 = pneg %p923_p13 }
  0x16   : > { %s745_s4 = scalar_lea.hbm %s1303_s0, 16384  ;;  %p746_p4 = scmp.lt.u32.totalorder %s919_s25, %s1303_s0 }
  0x17   : > { %p743_p2 = pnand %p742_p1, %p741_p0  ;;  %p747_p5 = scmp.lt.u32.totalorder %s745_s4, %s740_s30 }
  0x18   : > { %p749_p8 = scmp.lt.u32.totalorder %s740_s30, %s919_s25 }
  0x19   : > { %p744_p3 = pneg %p743_p2  ;;  %p748_p7 = por %p747_p5, %p746_p4 }
  0x1b   : > { %p750_p10 = por %p749_p8, %p748_p7 }
  0x1d   : > { %p751_p9 = pnand %p750_p10, %p744_p3 }
  0x1f   : > { %754 = shalt.err (!%p751_p9)
}
  0x20   : > { %s755_s13 = scalar_lea.vmem %s927_s27, 8192  ;;  %s838_s14 = smov [#allocation2]  }
  0x21   : > { %p756_p0 = scmp.ne.s32.totalorder %s927_s27, %s755_s13  ;;  %s760_s16 = sshll.u32 %s838_s14, 4  ;;  %s761_s16 = int_to_ptr.vmem [resolvable:$false] %s760_s16 }
  0x22   : > { %s762_s20 = scalar_lea.vmem %s761_s16, 16384  ;;  %p763_p11 = scmp.lt.s32.totalorder %s927_s27, %s761_s16 }
  0x23   : > { %p758_p2 = pnand %p756_p0, %p742_p1  ;;  %p764_p4 = scmp.lt.s32.totalorder %s762_s20, %s755_s13 }
  0x25   : > { %p759_p12 = pneg %p758_p2  ;;  %p765_p5 = por %p764_p4, %p763_p11 }
  0x27   : > { %p766_p7 = pnand %p765_p5, %p759_p12 }
  0x29   : > { %769 = shalt.err (!%p766_p7)
}
  0x2a   : > { %s839_s21 = smov 128   ;;  %s840_s22 = smov 8  }
  0x2b   : > { %695 = dma.hbm_to_vmem [thread:$0]  (!%p923_p13), %s919_s25, 8192, %s927_s27, %s929_s29, %s839_s21, %s839_s21, %s840_s22  }
  0x2c   : > { %p566_p9 = scmp.ge.s32.totalorder %s836_s9, 1  ;;  %p106_p1 = scmp.lt.s32.totalorder %s836_s9, 3 }
  0x2e   : > { %p107_p3 = pnand %p566_p9, %p106_p1 }
  0x2f   : > { %s960_s23 = sand.u32 (!%p107_p3), 1, %s828_s7  }
  0x30   : > { %110 = sbr.rel (%p107_p3) target bundleno = 279 (0x117), region = 24  ;;  %s567_s24 = sshll.u32 (!%p107_p3), %s960_s23, 9 }
  0x31   : > { %s113_s26 = scalar_lea.sflag (!%p107_p3), [#allocation3], %s960_s23  ;;  %s966_s30 = scalar_lea.vmem (!%p107_p3), [#allocation2], %s567_s24 }
  0x37   : > { %815 = dma.done.wait (%p899_p6), %s113_s26, 8192  }
  0x38   : > { %817 = vsyncadd (%p899_p6), %s113_s26, 4294959104  ;;  %v587_v0 = vld [vmem:[%s966_s30 + $0x90] sm:$0xff]  ;;  %v585_v1 = vld [vmem:[%s966_s30 + $0x80] sm:$0xff]  ;;  %s841_s25 = smov 1   ;;  %v151_v2 = vlaneseq  ;;  %s1011_s17 = scalar_lea.vmem [#allocation5], %s567_s24 }
  0x39   : > { %218 = vrot.lane.b32.xlu1 %v587_v0, %s841_s25  ;;  %214 = vrot.lane.b32.xlu0 %v585_v1, %s841_s25  ;;  %v588_v3 = vld [vmem:[%s966_s30 + $0x98] sm:$0xff]  ;;  %v586_v4 = vld [vmem:[%s966_s30 + $0x88] sm:$0xff]  ;;  %s842_s27 = smov 127   ;;  %s687_s28 = sshll.u32 %s877_s10, 13 }
  0x3a   : > { %v980_v5 = vshrl.u32 %v151_v2, 7  ;;  %v590_v6 = vld [vmem:[%s966_s30 + $0xa8] sm:$0xff]  ;;  %v589_v7 = vld [vmem:[%s966_s30 + $0xa0] sm:$0xff]  ;;  %v137_v10 = vld [vmem:[%s966_s30 + $0x10] sm:$0xff]  ;;  %s487_s29 = sshll.u32 %s1011_s17, 4  ;;  %s1255_s4 = scalar_lea.hbm %s1304_s1, %s687_s28  ;;  %s1257_s29 = int_to_ptr.vmem [resolvable:$true] %s487_s29 }
  0x3b   : > { %v135_v8 = vld [vmem:[%s966_s30] sm:$0xff]  ;;  %v136_v9 = vld [vmem:[%s966_s30 + $0x8] sm:$0xff]  ;;  %v138_v11 = vld [vmem:[%s966_s30 + $0x18] sm:$0xff]  ;;  %v144_v16 = vrot.slane %v137_v10, 7  ;;  %s474_s10 = scalar_lea.sflag [#allocation4], %s960_s23  ;;  %s770_s5 = scalar_lea.vmem %s1257_s29, 8192 }
  0x3c   : > { %v143_v12 = vrot.slane %v135_v8, 7  ;;  %v139_v13 = vld [vmem:[%s966_s30 + $0x20] sm:$0xff]  ;;  %v140_v14 = vld [vmem:[%s966_s30 + $0x28] sm:$0xff]  ;;  %v141_v15 = vld [vmem:[%s966_s30 + $0x30] sm:$0xff]  ;;  %v147_v17 = vrot.slane %v136_v9, 7  ;;  %v148_v18 = vrot.slane %v138_v11, 7  ;;  %p771_p6 = scmp.ne.s32.totalorder %s1257_s29, %s770_s5 }
  0x3d   : > { %220 = vrot.lane.b32.xlu1 %v588_v3, %s841_s25  ;;  %216 = vrot.lane.b32.xlu0 %v586_v4, %s841_s25  ;;  %vm153_vm0 = vcmp.lt.s32.totalorder %v980_v5, 1  ;;  %v142_v19 = vld [vmem:[%s966_s30 + $0x38] sm:$0xff]  ;;  %v145_v20 = vrot.slane %v139_v13, 7  ;;  %v146_v21 = vrot.slane %v141_v15, 7  ;;  %v149_v22 = vrot.slane %v140_v14, 7  ;;  %v591_v24 = vld [vmem:[%s966_s30 + $0xb0] sm:$0xff] }
  0x3e   : > { %v592_v23 = vld [vmem:[%s966_s30 + $0xb8] sm:$0xff]  ;;  %v150_v25 = vrot.slane %v142_v19, 7  ;;  %v154_v26 = vsel %vm153_vm0, %v143_v12, %v147_v17  ;;  %v155_v27 = vsel %vm153_vm0, %v144_v16, %v148_v18  ;;  %v158_v28 = vsel %vm153_vm0, %v147_v17, %v143_v12  ;;  %v602_v34 = vld [vmem:[%s966_s30 + $0xc8] sm:$0xff]  ;;  %v601_v35 = vld [vmem:[%s966_s30 + $0xc0] sm:$0xff]  ;;  %p1311_p11 = scmp.ne.s32.totalorder %s1308_s18, 0  ;;  %s843_s11 = smov [#allocation5]  }
  0x3f   : > { %v156_v29 = vsel %vm153_vm0, %v145_v20, %v149_v22  ;;  %v159_v30 = vsel %vm153_vm0, %v148_v18, %v144_v16  ;;  %v160_v31 = vsel %vm153_vm0, %v149_v22, %v145_v20  ;;  %162 = vst [vmem:[%s1011_s17] sm:$0xff] %v158_v28  ;;  %163 = vst [vmem:[%s1011_s17 + $0x8] sm:$0xff] %v154_v26  ;;  %v604_v36 = vld [vmem:[%s966_s30 + $0xd8] sm:$0xff]  ;;  %v603_v37 = vld [vmem:[%s966_s30 + $0xd0] sm:$0xff]  ;;  %vm187_vm1 = vcmp.lt.s32.totalorder %v980_v5, 7  ;;  %s774_s13 = sshll.u32 %s843_s11, 4  ;;  %s775_s13 = int_to_ptr.vmem [resolvable:$false] %s774_s13 }
  0x40   : > { %165 = vst [vmem:[%s1011_s17 + $0x18] sm:$0xff] %v155_v27  ;;  %v157_v32 = vsel %vm153_vm0, %v146_v21, %v150_v25  ;;  %v161_v33 = vsel %vm153_vm0, %v150_v25, %v146_v21  ;;  %164 = vst [vmem:[%s1011_s17 + $0x10] sm:$0xff] %v159_v30  ;;  %v569_v38 = vld [vmem:[%s966_s30 + $0x40] sm:$0xff]  ;;  %v570_v39 = vld [vmem:[%s966_s30 + $0x48] sm:$0xff]  ;;  %p772_p12 = pnand %p771_p6, %p1311_p11  ;;  %s776_s14 = scalar_lea.vmem %s775_s13, 16384 }
  0x41   : > { %224 = vrot.lane.b32.xlu1 %v590_v6, %s841_s25  ;;  %222 = vrot.lane.b32.xlu0 %v589_v7, %s841_s25  ;;  %166 = vst [vmem:[%s1011_s17 + $0x20] sm:$0xff] %v160_v31  ;;  %167 = vst [vmem:[%s1011_s17 + $0x28] sm:$0xff] %v156_v29  ;;  %v179_v46 = vrot.slane %v569_v38, 1  ;;  %v183_v50 = vrot.slane %v570_v39, 1  ;;  %p777_p8 = scmp.lt.s32.totalorder %s1257_s29, %s775_s13  ;;  %p778_p10 = scmp.lt.s32.totalorder %s776_s14, %s770_s5 }
  0x42   : > { %168 = vst [vmem:[%s1011_s17 + $0x30] sm:$0xff] %v161_v33  ;;  %169 = vst [vmem:[%s1011_s17 + $0x38] sm:$0xff] %v157_v32  ;;  %v571_v40 = vld [vmem:[%s966_s30 + $0x50] sm:$0xff]  ;;  %v573_v41 = vld [vmem:[%s966_s30 + $0x60] sm:$0xff]  ;;  %p773_p13 = pneg %p772_p12 }
  0x43   : > { %v572_v42 = vld [vmem:[%s966_s30 + $0x58] sm:$0xff]  ;;  %v574_v43 = vld [vmem:[%s966_s30 + $0x68] sm:$0xff]  ;;  %v575_v44 = vld [vmem:[%s966_s30 + $0x70] sm:$0xff]  ;;  %v180_v47 = vrot.slane %v571_v40, 1  ;;  %v181_v48 = vrot.slane %v573_v41, 1  ;;  %v188_v58 = vsel %vm187_vm1, %v179_v46, %v183_v50  ;;  %v192_v61 = vsel %vm187_vm1, %v183_v50, %v179_v46  ;;  %p779_p0 = por %p778_p10, %p777_p8 }
  0x44   : > { %v576_v45 = vld [vmem:[%s966_s30 + $0x78] sm:$0xff]  ;;  %v182_v49 = vrot.slane %v575_v44, 1  ;;  %v184_v51 = vrot.slane %v572_v42, 1  ;;  %v185_v52 = vrot.slane %v574_v43, 1  ;;  %v606_v53 = vld [vmem:[%s966_s30 + $0xe8] sm:$0xff]  ;;  %v605_v54 = vld [vmem:[%s966_s30 + $0xe0] sm:$0xff] }
  0x45   : > { %228 = vrot.lane.b32.xlu1 %v592_v23, %s841_s25  ;;  %226 = vrot.lane.b32.xlu0 %v591_v24, %s841_s25  ;;  %v186_v55 = vrot.slane %v576_v45, 1  ;;  %v617_v56 = vld [vmem:[%s966_s30 + $0x100] sm:$0xff]  ;;  %v618_v57 = vld [vmem:[%s966_s30 + $0x108] sm:$0xff]  ;;  %p780_p2 = pnand %p779_p0, %p773_p13 }
  0x46   : > { %v189_v59 = vsel %vm187_vm1, %v180_v47, %v184_v51  ;;  %v190_v60 = vsel %vm187_vm1, %v181_v48, %v185_v52  ;;  %v193_v63 = vsel %vm187_vm1, %v184_v51, %v180_v47  ;;  %v194_v0 = vsel %vm187_vm1, %v185_v52, %v181_v48  ;;  %577 = vst [vmem:[%s1011_s17 + $0x40] sm:$0xff] %v188_v58  ;;  %v608_v2 = vld [vmem:[%s966_s30 + $0xf8] sm:$0xff]  ;;  %v607_v3 = vld [vmem:[%s966_s30 + $0xf0] sm:$0xff]  ;;  %v621_v13 = vld [vmem:[%s966_s30 + $0x120] sm:$0xff] }
  0x47   : > { %v191_v62 = vsel %vm187_vm1, %v182_v49, %v186_v55  ;;  %v195_v1 = vsel %vm187_vm1, %v186_v55, %v182_v49  ;;  %578 = vst [vmem:[%s1011_s17 + $0x48] sm:$0xff] %v192_v61  ;;  %579 = vst [vmem:[%s1011_s17 + $0x50] sm:$0xff] %v189_v59  ;;  %v282_v4 = vrot.slane %v617_v56, 7  ;;  %v286_v6 = vrot.slane %v618_v57, 7  ;;  %v619_v7 = vld [vmem:[%s966_s30 + $0x110] sm:$0xff]  ;;  %v620_v8 = vld [vmem:[%s966_s30 + $0x118] sm:$0xff] }
  0x48   : > { %581 = vst [vmem:[%s1011_s17 + $0x60] sm:$0xff] %v190_v60  ;;  %580 = vst [vmem:[%s1011_s17 + $0x58] sm:$0xff] %v193_v63  ;;  %v283_v11 = vrot.slane %v619_v7, 7  ;;  %v287_v12 = vrot.slane %v620_v8, 7  ;;  %v622_v14 = vld [vmem:[%s966_s30 + $0x128] sm:$0xff]  ;;  %v284_v17 = vrot.slane %v621_v13, 7 }
  0x49   : > { %250 = vrot.lane.b32.xlu1 %v602_v34, %s842_s27  ;;  %248 = vrot.lane.b32.xlu0 %v601_v35, %s842_s27  ;;  %582 = vst [vmem:[%s1011_s17 + $0x68] sm:$0xff] %v194_v0  ;;  %583 = vst [vmem:[%s1011_s17 + $0x70] sm:$0xff] %v191_v62  ;;  %v290_v9 = vsel %vm153_vm0, %v282_v4, %v286_v6  ;;  %v294_v10 = vsel %vm153_vm0, %v286_v6, %v282_v4  ;;  %v288_v18 = vrot.slane %v622_v14, 7 }
  0x4a   : > { %584 = vst [vmem:[%s1011_s17 + $0x78] sm:$0xff] %v195_v1  ;;  %v291_v15 = vsel %vm153_vm0, %v283_v11, %v287_v12  ;;  %v295_v16 = vsel %vm153_vm0, %v287_v12, %v283_v11  ;;  %v623_v19 = vld [vmem:[%s966_s30 + $0x130] sm:$0xff]  ;;  %v624_v20 = vld [vmem:[%s966_s30 + $0x138] sm:$0xff]  ;;  %v633_v25 = vld [vmem:[%s966_s30 + $0x140] sm:$0xff] }
  0x4b   : > { %v292_v21 = vsel %vm153_vm0, %v284_v17, %v288_v18  ;;  %v296_v22 = vsel %vm153_vm0, %v288_v18, %v284_v17  ;;  %v285_v23 = vrot.slane %v623_v19, 7  ;;  %v289_v24 = vrot.slane %v624_v20, 7  ;;  %v634_v26 = vld [vmem:[%s966_s30 + $0x148] sm:$0xff]  ;;  %v635_v31 = vld [vmem:[%s966_s30 + $0x150] sm:$0xff]  ;;  %v636_v32 = vld [vmem:[%s966_s30 + $0x158] sm:$0xff] }
  0x4c   : > { %v332_v29 = vrot.slane %v633_v25, 7  ;;  %v336_v30 = vrot.slane %v634_v26, 7  ;;  %v333_v35 = vrot.slane %v635_v31, 7  ;;  %v638_v38 = vld [vmem:[%s966_s30 + $0x168] sm:$0xff]  ;;  %v639_v43 = vld [vmem:[%s966_s30 + $0x170] sm:$0xff]  ;;  %v640_v44 = vld [vmem:[%s966_s30 + $0x178] sm:$0xff] }
  0x4d   : > { %254 = vrot.lane.b32.xlu1 %v604_v36, %s842_s27  ;;  %252 = vrot.lane.b32.xlu0 %v603_v37, %s842_s27  ;;  %v293_v27 = vsel %vm153_vm0, %v285_v23, %v289_v24  ;;  %v297_v28 = vsel %vm153_vm0, %v289_v24, %v285_v23  ;;  %v337_v36 = vrot.slane %v636_v32, 7  ;;  %v637_v37 = vld [vmem:[%s966_s30 + $0x160] sm:$0xff]  ;;  %v338_v42 = vrot.slane %v638_v38, 7  ;;  %v650_v50 = vld [vmem:[%s966_s30 + $0x188] sm:$0xff] }
  0x4e   : > { %v340_v33 = vsel %vm153_vm0, %v332_v29, %v336_v30  ;;  %v344_v34 = vsel %vm153_vm0, %v336_v30, %v332_v29  ;;  %v334_v41 = vrot.slane %v637_v37, 7  ;;  %v335_v47 = vrot.slane %v639_v43, 7  ;;  %v649_v49 = vld [vmem:[%s966_s30 + $0x180] sm:$0xff]  ;;  %v651_v55 = vld [vmem:[%s966_s30 + $0x190] sm:$0xff]  ;;  %v652_v56 = vld [vmem:[%s966_s30 + $0x198] sm:$0xff] }
  0x4f   : > { %v341_v39 = vsel %vm153_vm0, %v333_v35, %v337_v36  ;;  %v345_v40 = vsel %vm153_vm0, %v337_v36, %v333_v35  ;;  %v339_v48 = vrot.slane %v640_v44, 7  ;;  %v383_v59 = vrot.slane %v651_v55, 1  ;;  %v653_v61 = vld [vmem:[%s966_s30 + $0x1a0] sm:$0xff]  ;;  %v654_v62 = vld [vmem:[%s966_s30 + $0x1a8] sm:$0xff]  ;;  %v656_v4 = vld [vmem:[%s966_s30 + $0x1b8] sm:$0xff] }
  0x50   : > { %v342_v45 = vsel %vm153_vm0, %v334_v41, %v338_v42  ;;  %v346_v46 = vsel %vm153_vm0, %v338_v42, %v334_v41  ;;  %v387_v60 = vrot.slane %v652_v56, 1  ;;  %v384_v1 = vrot.slane %v653_v61, 1  ;;  %v666_v11 = vld [vmem:[%s966_s30 + $0x1c8] sm:$0xff]  ;;  %v668_v17 = vld [vmem:[%s966_s30 + $0x1d8] sm:$0xff] }
  0x51   : > { %258 = vrot.lane.b32.xlu1 %v606_v53, %s842_s27  ;;  %256 = vrot.lane.b32.xlu0 %v605_v54, %s842_s27  ;;  %v343_v51 = vsel %vm153_vm0, %v335_v47, %v339_v48  ;;  %v347_v52 = vsel %vm153_vm0, %v339_v48, %v335_v47  ;;  %v382_v53 = vrot.slane %v649_v49, 1  ;;  %v386_v54 = vrot.slane %v650_v50, 1  ;;  %v670_v23 = vld [vmem:[%s966_s30 + $0x1e8] sm:$0xff]  ;;  %v672_v29 = vld [vmem:[%s966_s30 + $0x1f8] sm:$0xff] }
  0x52   : > { %v395_v63 = vsel %vm187_vm1, %v387_v60, %v383_v59  ;;  %v391_v0 = vsel %vm187_vm1, %v383_v59, %v387_v60 }
  0x53   : > { %v394_v57 = vsel %vm187_vm1, %v386_v54, %v382_v53  ;;  %v390_v58 = vsel %vm187_vm1, %v382_v53, %v386_v54 }
  0x55   : > { %262 = vrot.lane.b32.xlu1 %v608_v2, %s842_s27  ;;  %260 = vrot.lane.b32.xlu0 %v607_v3, %s842_s27  ;;  %v388_v2 = vrot.slane %v654_v62, 1  ;;  %v655_v3 = vld [vmem:[%s966_s30 + $0x1b0] sm:$0xff] }
  0x56   : > { %v385_v8 = vrot.slane %v655_v3, 1 }
  0x57   : > { %v396_v6 = vsel %vm187_vm1, %v388_v2, %v384_v1  ;;  %v392_v7 = vsel %vm187_vm1, %v384_v1, %v388_v2 }
  0x59   : > { %300 = vrot.lane.b32.xlu1 %v290_v9, %s841_s25  ;;  %298 = vrot.lane.b32.xlu0 %v294_v10, %s841_s25  ;;  %v389_v9 = vrot.slane %v656_v4, 1  ;;  %v665_v10 = vld [vmem:[%s966_s30 + $0x1c0] sm:$0xff] }
  0x5a   : > { %v432_v14 = vrot.slane %v665_v10, 1 }
  0x5b   : > { %v397_v12 = vsel %vm187_vm1, %v389_v9, %v385_v8  ;;  %v393_v13 = vsel %vm187_vm1, %v385_v8, %v389_v9 }
  0x5d   : > { %304 = vrot.lane.b32.xlu1 %v291_v15, %s841_s25  ;;  %302 = vrot.lane.b32.xlu0 %v295_v16, %s841_s25  ;;  %v436_v15 = vrot.slane %v666_v11, 1  ;;  %v667_v16 = vld [vmem:[%s966_s30 + $0x1d0] sm:$0xff] }
  0x5e   : > { %v433_v20 = vrot.slane %v667_v16, 1 }
  0x5f   : > { %v444_v18 = vsel %vm187_vm1, %v436_v15, %v432_v14  ;;  %v440_v19 = vsel %vm187_vm1, %v432_v14, %v436_v15 }
  0x61   : > { %308 = vrot.lane.b32.xlu1 %v292_v21, %s841_s25  ;;  %306 = vrot.lane.b32.xlu0 %v296_v22, %s841_s25  ;;  %v437_v21 = vrot.slane %v668_v17, 1  ;;  %v669_v22 = vld [vmem:[%s966_s30 + $0x1e0] sm:$0xff] }
  0x62   : > { %v434_v26 = vrot.slane %v669_v22, 1 }
  0x63   : > { %v445_v24 = vsel %vm187_vm1, %v437_v21, %v433_v20  ;;  %v441_v25 = vsel %vm187_vm1, %v433_v20, %v437_v21 }
  0x65   : > { %312 = vrot.lane.b32.xlu1 %v293_v27, %s841_s25  ;;  %310 = vrot.lane.b32.xlu0 %v297_v28, %s841_s25  ;;  %v438_v27 = vrot.slane %v670_v23, 1  ;;  %v671_v28 = vld [vmem:[%s966_s30 + $0x1f0] sm:$0xff] }
  0x66   : > { %v435_v32 = vrot.slane %v671_v28, 1 }
  0x67   : > { %v446_v30 = vsel %vm187_vm1, %v438_v27, %v434_v26  ;;  %v442_v31 = vsel %vm187_vm1, %v434_v26, %v438_v27 }
  0x69   : > { %350 = vrot.lane.b32.xlu1 %v340_v33, %s842_s27  ;;  %348 = vrot.lane.b32.xlu0 %v344_v34, %s842_s27  ;;  %v439_v33 = vrot.slane %v672_v29, 1 }
  0x6b   : > { %v447_v34 = vsel %vm187_vm1, %v439_v33, %v435_v32  ;;  %v443_v35 = vsel %vm187_vm1, %v435_v32, %v439_v33 }
  0x6d   : > { %354 = vrot.lane.b32.xlu1 %v341_v39, %s842_s27  ;;  %352 = vrot.lane.b32.xlu0 %v345_v40, %s842_s27 }
  0x71   : > { %358 = vrot.lane.b32.xlu1 %v342_v45, %s842_s27  ;;  %356 = vrot.lane.b32.xlu0 %v346_v46, %s842_s27 }
  0x75   : > { %362 = vrot.lane.b32.xlu1 %v343_v51, %s842_s27  ;;  %360 = vrot.lane.b32.xlu0 %v347_v52, %s842_s27 }
  0x79   : > { %400 = vrot.lane.b32.xlu1 %v394_v57, %s841_s25  ;;  %398 = vrot.lane.b32.xlu0 %v390_v58, %s841_s25 }
  0x7d   : > { %404 = vrot.lane.b32.xlu1 %v395_v63, %s841_s25  ;;  %402 = vrot.lane.b32.xlu0 %v391_v0, %s841_s25 }
  0x81   : > { %408 = vrot.lane.b32.xlu1 %v396_v6, %s841_s25  ;;  %406 = vrot.lane.b32.xlu0 %v392_v7, %s841_s25 }
  0x85   : > { %412 = vrot.lane.b32.xlu1 %v397_v12, %s841_s25  ;;  %410 = vrot.lane.b32.xlu0 %v393_v13, %s841_s25 }
  0x89   : > { %450 = vrot.lane.b32.xlu1 %v444_v18, %s842_s27  ;;  %448 = vrot.lane.b32.xlu0 %v440_v19, %s842_s27 }
  0x8d   : > { %454 = vrot.lane.b32.xlu1 %v445_v24, %s842_s27  ;;  %452 = vrot.lane.b32.xlu0 %v441_v25, %s842_s27 }
  0x91   : > { %458 = vrot.lane.b32.xlu1 %v446_v30, %s842_s27  ;;  %456 = vrot.lane.b32.xlu0 %v442_v31, %s842_s27 }
  0x95   : > { %462 = vrot.lane.b32.xlu1 %v447_v34, %s842_s27  ;;  %460 = vrot.lane.b32.xlu0 %v443_v35, %s842_s27 }
  0xab   : > { %v219_v36 = vpop.permute.xlu1 %218  ;;  %v215_v37 = vpop.permute.xlu0 %214 }
  0xac   : > { %595 = vst [vmem:[%s1011_s17 + $0x90] sm:$0xff] %v219_v36  ;;  %593 = vst [vmem:[%s1011_s17 + $0x80] sm:$0xff] %v215_v37 }
  0xaf   : > { %v221_v38 = vpop.permute.xlu1 %220  ;;  %v217_v39 = vpop.permute.xlu0 %216 }
  0xb0   : > { %596 = vst [vmem:[%s1011_s17 + $0x98] sm:$0xff] %v221_v38  ;;  %594 = vst [vmem:[%s1011_s17 + $0x88] sm:$0xff] %v217_v39 }
  0xb3   : > { %v225_v5 = vpop.permute.xlu1 %224  ;;  %v223_v40 = vpop.permute.xlu0 %222 }
  0xb4   : > { %598 = vst [vmem:[%s1011_s17 + $0xa8] sm:$0xff] %v225_v5  ;;  %597 = vst [vmem:[%s1011_s17 + $0xa0] sm:$0xff] %v223_v40 }
  0xb7   : > { %v229_v41 = vpop.permute.xlu1 %228  ;;  %v227_v42 = vpop.permute.xlu0 %226 }
  0xb8   : > { %600 = vst [vmem:[%s1011_s17 + $0xb8] sm:$0xff] %v229_v41  ;;  %599 = vst [vmem:[%s1011_s17 + $0xb0] sm:$0xff] %v227_v42 }
  0xbb   : > { %v251_v43 = vpop.permute.xlu1 %250  ;;  %v249_v44 = vpop.permute.xlu0 %248 }
  0xbc   : > { %610 = vst [vmem:[%s1011_s17 + $0xc8] sm:$0xff] %v251_v43  ;;  %609 = vst [vmem:[%s1011_s17 + $0xc0] sm:$0xff] %v249_v44 }
  0xbf   : > { %v255_v45 = vpop.permute.xlu1 %254  ;;  %v253_v46 = vpop.permute.xlu0 %252 }
  0xc0   : > { %612 = vst [vmem:[%s1011_s17 + $0xd8] sm:$0xff] %v255_v45  ;;  %611 = vst [vmem:[%s1011_s17 + $0xd0] sm:$0xff] %v253_v46 }
  0xc3   : > { %v259_v47 = vpop.permute.xlu1 %258  ;;  %v257_v48 = vpop.permute.xlu0 %256 }
  0xc4   : > { %614 = vst [vmem:[%s1011_s17 + $0xe8] sm:$0xff] %v259_v47  ;;  %613 = vst [vmem:[%s1011_s17 + $0xe0] sm:$0xff] %v257_v48 }
  0xc7   : > { %v263_v49 = vpop.permute.xlu1 %262  ;;  %v261_v50 = vpop.permute.xlu0 %260 }
  0xc8   : > { %616 = vst [vmem:[%s1011_s17 + $0xf8] sm:$0xff] %v263_v49  ;;  %615 = vst [vmem:[%s1011_s17 + $0xf0] sm:$0xff] %v261_v50 }
  0xcb   : > { %v301_v51 = vpop.permute.xlu1 %300  ;;  %v299_v52 = vpop.permute.xlu0 %298 }
  0xcc   : > { %626 = vst [vmem:[%s1011_s17 + $0x108] sm:$0xff] %v301_v51  ;;  %625 = vst [vmem:[%s1011_s17 + $0x100] sm:$0xff] %v299_v52 }
  0xcf   : > { %v305_v53 = vpop.permute.xlu1 %304  ;;  %v303_v54 = vpop.permute.xlu0 %302 }
  0xd0   : > { %628 = vst [vmem:[%s1011_s17 + $0x118] sm:$0xff] %v305_v53  ;;  %627 = vst [vmem:[%s1011_s17 + $0x110] sm:$0xff] %v303_v54 }
  0xd3   : > { %v309_v55 = vpop.permute.xlu1 %308  ;;  %v307_v56 = vpop.permute.xlu0 %306 }
  0xd4   : > { %630 = vst [vmem:[%s1011_s17 + $0x128] sm:$0xff] %v309_v55  ;;  %629 = vst [vmem:[%s1011_s17 + $0x120] sm:$0xff] %v307_v56 }
  0xd7   : > { %v313_v57 = vpop.permute.xlu1 %312  ;;  %v311_v58 = vpop.permute.xlu0 %310 }
  0xd8   : > { %632 = vst [vmem:[%s1011_s17 + $0x138] sm:$0xff] %v313_v57  ;;  %631 = vst [vmem:[%s1011_s17 + $0x130] sm:$0xff] %v311_v58 }
  0xdb   : > { %v351_v59 = vpop.permute.xlu1 %350  ;;  %v349_v60 = vpop.permute.xlu0 %348 }
  0xdc   : > { %642 = vst [vmem:[%s1011_s17 + $0x148] sm:$0xff] %v351_v59  ;;  %641 = vst [vmem:[%s1011_s17 + $0x140] sm:$0xff] %v349_v60 }
  0xdf   : > { %v355_v61 = vpop.permute.xlu1 %354  ;;  %v353_v62 = vpop.permute.xlu0 %352 }
  0xe0   : > { %644 = vst [vmem:[%s1011_s17 + $0x158] sm:$0xff] %v355_v61  ;;  %643 = vst [vmem:[%s1011_s17 + $0x150] sm:$0xff] %v353_v62 }
  0xe3   : > { %v359_v63 = vpop.permute.xlu1 %358  ;;  %v357_v0 = vpop.permute.xlu0 %356 }
  0xe4   : > { %646 = vst [vmem:[%s1011_s17 + $0x168] sm:$0xff] %v359_v63  ;;  %645 = vst [vmem:[%s1011_s17 + $0x160] sm:$0xff] %v357_v0 }
  0xe7   : > { %v363_v1 = vpop.permute.xlu1 %362  ;;  %v361_v2 = vpop.permute.xlu0 %360 }
  0xe8   : > { %648 = vst [vmem:[%s1011_s17 + $0x178] sm:$0xff] %v363_v1  ;;  %647 = vst [vmem:[%s1011_s17 + $0x170] sm:$0xff] %v361_v2 }
  0xeb   : > { %v401_v3 = vpop.permute.xlu1 %400  ;;  %v399_v4 = vpop.permute.xlu0 %398 }
  0xec   : > { %658 = vst [vmem:[%s1011_s17 + $0x188] sm:$0xff] %v401_v3  ;;  %657 = vst [vmem:[%s1011_s17 + $0x180] sm:$0xff] %v399_v4 }
  0xef   : > { %v405_v6 = vpop.permute.xlu1 %404  ;;  %v403_v7 = vpop.permute.xlu0 %402 }
  0xf0   : > { %660 = vst [vmem:[%s1011_s17 + $0x198] sm:$0xff] %v405_v6  ;;  %659 = vst [vmem:[%s1011_s17 + $0x190] sm:$0xff] %v403_v7 }
  0xf3   : > { %v409_v8 = vpop.permute.xlu1 %408  ;;  %v407_v9 = vpop.permute.xlu0 %406 }
  0xf4   : > { %662 = vst [vmem:[%s1011_s17 + $0x1a8] sm:$0xff] %v409_v8  ;;  %661 = vst [vmem:[%s1011_s17 + $0x1a0] sm:$0xff] %v407_v9 }
  0xf7   : > { %v413_v10 = vpop.permute.xlu1 %412  ;;  %v411_v11 = vpop.permute.xlu0 %410 }
  0xf8   : > { %664 = vst [vmem:[%s1011_s17 + $0x1b8] sm:$0xff] %v413_v10  ;;  %663 = vst [vmem:[%s1011_s17 + $0x1b0] sm:$0xff] %v411_v11 }
  0xfb   : > { %v451_v12 = vpop.permute.xlu1 %450  ;;  %v449_v13 = vpop.permute.xlu0 %448 }
  0xfc   : > { %674 = vst [vmem:[%s1011_s17 + $0x1c8] sm:$0xff] %v451_v12  ;;  %673 = vst [vmem:[%s1011_s17 + $0x1c0] sm:$0xff] %v449_v13 }
  0xff   : > { %v455_v14 = vpop.permute.xlu1 %454  ;;  %v453_v15 = vpop.permute.xlu0 %452 }
 0x100   : > { %676 = vst [vmem:[%s1011_s17 + $0x1d8] sm:$0xff] %v455_v14  ;;  %675 = vst [vmem:[%s1011_s17 + $0x1d0] sm:$0xff] %v453_v15 }
 0x103   : > { %v459_v16 = vpop.permute.xlu1 %458  ;;  %v457_v17 = vpop.permute.xlu0 %456 }
 0x104   : > { %678 = vst [vmem:[%s1011_s17 + $0x1e8] sm:$0xff] %v459_v16  ;;  %677 = vst [vmem:[%s1011_s17 + $0x1e0] sm:$0xff] %v457_v17 }
 0x107   : > { %v463_v18 = vpop.permute.xlu1 %462  ;;  %v461_v19 = vpop.permute.xlu0 %460 }
 0x108   : > { %680 = vst [vmem:[%s1011_s17 + $0x1f8] sm:$0xff] %v463_v18  ;;  %679 = vst [vmem:[%s1011_s17 + $0x1f0] sm:$0xff] %v461_v19 }
 0x109   : > { %783 = shalt.err (!%p780_p2)
}
 0x10a   : > { %s784_s16 = scalar_lea.hbm %s1255_s4, 8192  ;;  %s788_s22 = scalar_lea.hbm %s1304_s1, 16384 }
 0x10b   : > { %p785_p4 = scmp.ne.s32.totalorder %s1255_s4, %s784_s16  ;;  %p789_p9 = scmp.lt.u32.totalorder %s1255_s4, %s1304_s1 }
 0x10c   : > { %p790_p1 = scmp.lt.u32.totalorder %s788_s22, %s784_s16  ;;  %p792_p6 = scmp.lt.u32.totalorder %s784_s16, %s1255_s4 }
 0x10d   : > { %p786_p5 = pnand %p785_p4, %p1311_p11 }
 0x10e   : > { %p791_p3 = por %p790_p1, %p789_p9 }
 0x10f   : > { %p787_p7 = pneg %p786_p5 }
 0x110   : > { %p793_p12 = por %p792_p6, %p791_p3 }
 0x112   : > { %p794_p13 = pnand %p793_p12, %p787_p7 }
 0x114   : > { %797 = shalt.err (!%p794_p13)
}
 0x115   : > { %s844_s30 = smov 128   ;;  %s845_s25 = smov 8  }
 0x116   : > { %690 = dma.vmem_to_hbm [thread:$0]  (%p1311_p11), %s1257_s29, 8192, %s1255_s4, %s474_s10, %s844_s30, %s844_s30, %s845_s25  }
 0x117 PF: > { %s502_s17 = sand.u32 1, %s824_s6   ;;  %p1312_p8 = scmp.ne.s32.totalorder %s1309_s19, 0 }
 0x118   : > { %p1313_p10 = scmp.ge.s32.totalorder %s836_s9, 2  ;;  %s503_s27 = scalar_lea.sflag [#allocation4], %s502_s17 }
 0x11a   : > { %p697_p0 = pnand %p1313_p10, %p1312_p8 }
 0x11c   : > { %819 = dma.done.wait (!%p697_p0), %s503_s27, 8192  }
 0x11d   : > { %821 = vsyncadd (!%p697_p0), %s503_s27, 4294959104  ;;  %p14_p2 = scmp.ge.s32.totalorder %s881_s12, 4   ;;  %s1314_s6 = smov %s828_s7 }
 0x11e   : > { %s1315_s7 = smov %s832_s8  ;;  %s1316_s8 = smov %s893_s15 }
 0x11f   : > { %s1317_s9 = smov %s881_s12  ;;  %16 = sbr.rel (!%p14_p2) target bundleno = 5 (0x5), region = 83 }
 0x126   :  { %508 = vsyncpa [#allocation3], 1 }
 0x127   :  { %510 = vsyncpa [#allocation3 + $0x1], 1 }
 0x128   :  { %511 = vsyncpa [#allocation4], 1 }
 0x129   :  { %513 = vsyncpa [#allocation4 + $0x1], 1 }

</bundles_post_ra>
